<compile_context>
chip_gen: v7x
topology: tpu7x:2x2x1
jax: 0.10.0
libtpu: 0.0.40
codegen_flags: <defaults>
</compile_context>

<pallas_src>
import functools

import jax
import jax.numpy as jnp
from jax.experimental import pallas as pl
from jax.experimental.pallas import tpu as pltpu

LANES = 128
SUBLANES = 8
TARGET_BLOCK_BYTES = 4 * 1024 * 1024   # per input, per block (double-buffered)
MAX_BLOCK_ROWS = 16384                 # caps the f32 `diff` temp at 8 MiB
VMEM_LIMIT_BYTES = 40 * 1024 * 1024    # 2 in x 2 buf x 4 MiB + f32 temps + slack


def _round_up(x, m):
    return ((x + m - 1) // m) * m


def _num_tensorcores():
    """Best-effort TensorCore count; default 1 (v5e/v6e are single-TC)."""
    try:
        info = pltpu.get_tpu_info()
        for name in ("num_cores", "core_count", "num_tensorcores",
                     "tensorcore_count", "cores_per_chip"):
            v = getattr(info, name, None)
            if isinstance(v, int) and v > 0:
                return min(int(v), 2)
    except Exception:
        pass
    try:
        kind = jax.devices()[0].device_kind.lower()
        if "v7" in kind:
            return 2
    except Exception:
        pass
    return 1


def _pick_block_rows(rows, itemsize, num_cores):
    """Pick block rows: ~TARGET_BLOCK_BYTES per input, multiple of 32 when
    possible, preferring a size that tiles `rows` exactly into a
    multiple-of-num_cores block count (-> no mask, no dummy block)."""
    target = TARGET_BLOCK_BYTES // (LANES * itemsize)
    target = max(32, (min(target, MAX_BLOCK_ROWS) // 32) * 32)
    if rows <= target:
        # Single (nearly) full block; multiple of 8 so the in-kernel regroup
        # reshape stays tile-aligned.  A block larger than `rows` is legal;
        # the garbage rows are discarded by the edge mask.
        return _round_up(rows, SUBLANES)
    lo = max(32, target // 2)
    for br in range(target, lo - 1, -32):
        if rows % br == 0 and (rows // br) % num_cores == 0:
            return br
    return target


def _l1_sum_kernel(pred_ref, true_ref, out_ref, *, rows, block_rows, bpc,
                   may_mask):
    """Accumulate sum(|pred - true|) into a per-core (8,128) f32 partial."""
    c = pl.program_id(0)   # core / partial-sum index ("parallel")
    i = pl.program_id(1)   # reduction step over row-blocks ("arbitrary")

    @pl.when(i == 0)
    def _init():
        out_ref[...] = jnp.zeros_like(out_ref)

    def accumulate(masked):
        # Cast per-tile on the VPU (avoids streaming an upcast copy from HBM
        # and avoids unsigned wraparound for integer inputs).
        diff = jnp.abs(pred_ref[...].astype(jnp.float32)
                       - true_ref[...].astype(jnp.float32))
        if masked:
            # Row-granular mask: zero rows past the end of the slab (partial
            # tail block and/or the clamped dummy block of the last core).
            base = (c * bpc + i) * block_rows
            row_ids = base + jax.lax.broadcasted_iota(
                jnp.int32, (block_rows, 1), 0)
            diff = jnp.where(row_ids < rows, diff, 0.0)
        # (block_rows,128) -> (block_rows//8, 8, 128): aligned with the native
        # (8,128) tiling, so the reshape is free and the reduction over the
        # group axis is pure vreg-wise VPU adds (no per-tile XLU reduce).
        out_ref[...] += diff.reshape(block_rows // SUBLANES, SUBLANES,
                                     LANES).sum(axis=0)

    if may_mask:
        block_end = (c * bpc + i + 1) * block_rows
        in_bounds = block_end <= rows

        @pl.when(in_bounds)                      # interior blocks: no mask cost
        def _fast():
            accumulate(masked=False)

        @pl.when(jnp.logical_not(in_bounds))     # edge / dummy blocks only
        def _edge():
            accumulate(masked=True)
    else:
        accumulate(masked=False)


@jax.jit
def l1_loss(pred, true):
    assert pred.shape == true.shape, "pred/true must have the same shape"
    n = pred.size
    itemsize = jnp.dtype(pred.dtype).itemsize
    num_cores = _num_tensorcores()

    # Flatten in native dtype (free for contiguous inputs; no upcast copy).
    flat_pred = pred.reshape(-1)
    flat_true = true.reshape(-1)

    # Pad only up to the next lane row (multiple of 128); the zero padding
    # contributes |0-0| = 0.  Rows past `rows` in a partial last block are
    # unspecified VMEM and are discarded by the in-kernel edge mask.
    pad = (-n) % LANES
    if pad:
        # TODO(synk): a fully copy-free tail would need a manual 1-D DMA path.
        flat_pred = jnp.pad(flat_pred, (0, pad))
        flat_true = jnp.pad(flat_true, (0, pad))
    rows = (n + pad) // LANES

    pred2d = flat_pred.reshape(rows, LANES)
    true2d = flat_true.reshape(rows, LANES)

    block_rows = _pick_block_rows(rows, itemsize, num_cores)
    total_blocks = pl.cdiv(rows, block_rows)
    bpc = pl.cdiv(total_blocks, num_cores)          # blocks per core
    overflow = (num_cores * bpc) != total_blocks    # dummy block on last core
    partial_tail = (rows % block_rows) != 0         # last block extends past rows
    may_mask = overflow or partial_tail

    def in_map(c, i):
        blk = c * bpc + i
        if overflow:
            # Clamp the out-of-range dummy block to the last real block; its
            # contribution is zeroed by the in-kernel row mask.
            blk = jnp.minimum(blk, total_blocks - 1)
        return (blk, 0)

    kernel = functools.partial(
        _l1_sum_kernel,
        rows=rows, block_rows=block_rows, bpc=bpc, may_mask=may_mask)

    partials = pl.pallas_call(
        kernel,
        out_shape=jax.ShapeDtypeStruct((num_cores * SUBLANES, LANES),
                                       jnp.float32),
        grid_spec=pltpu.PrefetchScalarGridSpec(
            num_scalar_prefetch=0,
            grid=(num_cores, bpc),
            in_specs=[
                pl.BlockSpec((block_rows, LANES), in_map),
                pl.BlockSpec((block_rows, LANES), in_map),
            ],
            # Per-core (8,128) partial sum, resident across the reduction axis.
            out_specs=pl.BlockSpec((SUBLANES, LANES), lambda c, i: (c, 0)),
        ),
        compiler_params=pltpu.CompilerParams(
            # TODO(synk): on v7x, pltpu.CORE_PARALLEL on axis 0 would guarantee
            # the 2-TensorCore split; plain "parallel" is kept for portability.
            dimension_semantics=("parallel", "arbitrary"),
            vmem_limit_bytes=VMEM_LIMIT_BYTES,
        ),
        cost_estimate=pl.CostEstimate(
            flops=3 * n,
            transcendentals=0,
            bytes_accessed=2 * n * itemsize,
        ),
    )(pred2d, true2d)

    # Tiny final cross-lane reduction + mean, done once in the wrapper.
    total = jnp.sum(partials)
    return (total / jnp.float32(n)).astype(jnp.float32)


if __name__ == "__main__":
    key = jax.random.PRNGKey(0)
    k1, k2 = jax.random.split(key)
    # NCHW, same as the PyTorch module's expected inputs.
    pred = jax.random.normal(k1, (2, 4, 16, 16), dtype=jnp.float32)
    true = jax.random.normal(k2, (2, 4, 16, 16), dtype=jnp.float32)

    loss = l1_loss(pred, true)
    jax.block_until_ready(loss)

    # Cross-check against plain-JAX reference.
    ref = jnp.mean(jnp.abs(pred - true))
    assert jnp.allclose(loss, ref, rtol=1e-6, atol=1e-6), (loss, ref)

    print("KERNEL_OK")
</pallas_src>

<mosaic_0001>
module attributes {stable_mosaic.version = 11 : i64} {
  func.func @_l1_sum_kernel(%arg0: i32, %arg1: i32, %arg2: memref<16x128xf32, #tpu.memory_space<vmem>>, %arg3: memref<16x128xf32, #tpu.memory_space<vmem>>, %arg4: memref<8x128xf32, #tpu.memory_space<vmem>>) attributes {dimension_semantics = [#tpu.dimension_semantics<parallel>, #tpu.dimension_semantics<arbitrary>], iteration_bounds = array<i64: 1, 1>, scalar_prefetch = 0 : i64, scratch_operands = 0 : i64, tpu.core_type = #tpu.core_type<tc>, window_params = [{transform_indices = @transform_0, window_bounds = array<i64: 16, 128>}, {transform_indices = @transform_1, window_bounds = array<i64: 16, 128>}, {transform_indices = @transform_2, window_bounds = array<i64: 8, 128>}]} {
    %c0_i32 = arith.constant 0 : i32
    %0 = arith.cmpi eq, %arg1, %c0_i32 : i32
    %1 = arith.extui %0 : i1 to i32
    %c0_i32_0 = arith.constant 0 : i32
    %2 = arith.cmpi ne, %1, %c0_i32_0 : i32
    scf.if %2 {
      %cst_8 = arith.constant 0.000000e+00 : f32
      %12 = vector.broadcast %cst_8 : f32 to vector<8x128xf32>
      %c0_9 = arith.constant 0 : index
      %c0_10 = arith.constant 0 : index
      %13 = vector.load %arg4[%c0_9, %c0_10] : memref<8x128xf32, #tpu.memory_space<vmem>>, vector<8x128xf32>
      tpu.vector_store %arg4[%c0_9, %c0_10], %12 {strides = array<i32>} : memref<8x128xf32, #tpu.memory_space<vmem>>, vector<8x128xf32>,
    } else {
    }
    %c0 = arith.constant 0 : index
    %c0_1 = arith.constant 0 : index
    %3 = vector.load %arg2[%c0, %c0_1] : memref<16x128xf32, #tpu.memory_space<vmem>>, vector<16x128xf32>
    %c0_2 = arith.constant 0 : index
    %c0_3 = arith.constant 0 : index
    %4 = vector.load %arg3[%c0_2, %c0_3] : memref<16x128xf32, #tpu.memory_space<vmem>>, vector<16x128xf32>
    %5 = arith.subf %3, %4 : vector<16x128xf32>
    %6 = math.absf %5 : vector<16x128xf32>
    %c0_4 = arith.constant 0 : index
    %c0_5 = arith.constant 0 : index
    %7 = vector.load %arg4[%c0_4, %c0_5] : memref<8x128xf32, #tpu.memory_space<vmem>>, vector<8x128xf32>
    %8 = vector.shape_cast %6 : vector<16x128xf32> to vector<2x8x128xf32>
    %cst = arith.constant dense<0.000000e+00> : vector<8x128xf32>
    %9 = vector.multi_reduction <add>, %8, %cst [0] : vector<2x8x128xf32> to vector<8x128xf32>
    %10 = arith.addf %7, %9 : vector<8x128xf32>
    %c0_6 = arith.constant 0 : index
    %c0_7 = arith.constant 0 : index
    %11 = vector.load %arg4[%c0_6, %c0_7] : memref<8x128xf32, #tpu.memory_space<vmem>>, vector<8x128xf32>
    tpu.vector_store %arg4[%c0_6, %c0_7], %10 {strides = array<i32>} : memref<8x128xf32, #tpu.memory_space<vmem>>, vector<8x128xf32>,
    return
  }
  func.func @transform_0(%arg0: i32, %arg1: i32) -> (i32, i32) {
    %c1_i32 = arith.constant 1 : i32
    %0 = arith.muli %arg0, %c1_i32 : i32
    %1 = arith.addi %0, %arg1 : i32
    %c0_i32 = arith.constant 0 : i32
    %c0_i32_0 = arith.constant 0 : i32
    return %1, %c0_i32 : i32, i32
  }
  func.func @transform_1(%arg0: i32, %arg1: i32) -> (i32, i32) {
    %c1_i32 = arith.constant 1 : i32
    %0 = arith.muli %arg0, %c1_i32 : i32
    %1 = arith.addi %0, %arg1 : i32
    %c0_i32 = arith.constant 0 : i32
    %c0_i32_0 = arith.constant 0 : i32
    return %1, %c0_i32 : i32, i32
  }
  func.func @transform_2(%arg0: i32, %arg1: i32) -> (i32, i32) {
    %c0_i32 = arith.constant 0 : i32
    %c0_i32_0 = arith.constant 0 : i32
    return %arg0, %c0_i32 : i32, i32
  }
}

</mosaic_0001>

<bundles_post_ra>
// kernel: l1_loss.1
= control target key start
LH: loop header
LB: loop body
LE: loop exit
PB: predicated region body
PF: predicated region fallthrough
CT: control target
= control target key end

     0   :  { %s119_s0 = inlined_call_operand.vmem [shape: f32[16,128], index: 0, kind: input, shape index: {}]   ;;  %s120_s1 = inlined_call_operand.vmem [shape: f32[16,128], index: 1, kind: input, shape index: {}]   ;;  %s121_s2 = inlined_call_operand.vmem [shape: f32[8,128], index: 2, kind: output, shape index: {}]  }
   0x1   :  { %v60_v0 = vld [vmem:[%s119_s0] sm:$0xff]  ;;  %v61_v1 = vld [vmem:[%s119_s0 + $0x8] sm:$0xff] }
   0x2   :  { %v62_v2 = vld [vmem:[%s120_s1] sm:$0xff]  ;;  %v63_v3 = vld [vmem:[%s120_s1 + $0x8] sm:$0xff] }
   0x3   :  { %v64_v4 = vsub.f32 %v60_v0, %v62_v2  ;;  %v65_v5 = vsub.f32 %v61_v1, %v63_v3 }
   0x5   :  { %v66_v6 = vand.u32 2147483647, %v64_v4  ;;  %v67_v7 = vand.u32 2147483647, %v65_v5 }
   0x7   :  { %v69_v8 = vadd.f32 %v67_v7, %v66_v6 }
   0x9   :  { %71 = vst [vmem:[%s121_s2] sm:$0xff] %v69_v8 }

</bundles_post_ra>
